<compile_context>
chip_gen: v7x
topology: tpu7x:2x2x1
jax: 0.10.0
libtpu: 0.0.40
codegen_flags: <defaults>
</compile_context>

<pallas_src>
import functools

import jax
import jax.numpy as jnp
import numpy as np
from jax.experimental import pallas as pl
from jax.experimental.pallas import tpu as pltpu

ALPHA = 0.1
EPS = 1e-5
_LANE = 128


# ----------------------------------------------------------------------------
# Pass 1: 3x3x3 conv (3 MXU matmuls) + per-tile channel statistics
# ----------------------------------------------------------------------------
def _conv_pass_kernel(x_ref, t_ref, conv_ref, stats_ref, *, tile_d, hblk):
    """One (batch, D-tile) grid step.

    x_ref    : ((tile_d+2)*hblk, Kb)  banded input tile (includes 2 D halo rows)
    t_ref    : (3, Kb, Nb)            banded weights, one slab per kd tap
    conv_ref : (tile_d*hblk, Nb)      conv output tile (lane-dense)
    stats_ref: (2, Nb)                per-tile partial sum / sum-of-squares
    """
    rows = tile_d * hblk
    # kd tap == static row shift of the banded input; kh/kw/Cin are folded
    # into the contraction (Kb) of each dot.  Accumulate as values (no VMEM
    # accumulator scratch, single store into conv_ref).
    y = jnp.dot(x_ref[0:rows, :], t_ref[0],
                preferred_element_type=jnp.float32)
    for kd in (1, 2):
        y = y + jnp.dot(x_ref[kd * hblk:kd * hblk + rows, :], t_ref[kd],
                        preferred_element_type=jnp.float32)
    conv_ref[...] = y.astype(conv_ref.dtype)

    # Raw per-lane partial statistics; the (HF*W, Cout) fold happens in the
    # jnp epilogue (no in-kernel lane->sublane reshape).
    stats_ref[0:1, :] = jnp.sum(y, axis=0, keepdims=True)
    stats_ref[1:2, :] = jnp.sum(y * y, axis=0, keepdims=True)


# ----------------------------------------------------------------------------
# Pass 2 (in place): out = LeakyReLU((conv - mean) * rstd)
# ----------------------------------------------------------------------------
def _norm_lrelu_kernel(y_ref, scale_ref, shift_ref, o_ref):
    z = y_ref[...].astype(jnp.float32) * scale_ref[...] + shift_ref[...]
    o_ref[...] = jnp.where(z >= 0, z, ALPHA * z).astype(o_ref.dtype)


# ----------------------------------------------------------------------------
# Banded weight construction
# ----------------------------------------------------------------------------
def _build_banded_weights(w_oidhw, W, hf):
    """(Cout, Cin, 3,3,3) -> (3, (hf+2)*(W+2)*Cin, hf*W*Cout).

    T[kd, (g*(W+2) + wp)*Cin + ci, (j*W + wo)*Cout + co] =
        w[co, ci, kd, g - j, wp - wo]   when g-j, wp-wo in {0,1,2}, else 0.
    """
    Cout, Cin = w_oidhw.shape[0], w_oidhw.shape[1]
    wt = jnp.transpose(w_oidhw, (2, 3, 4, 1, 0))          # (kd, kh, kw, Cin, Cout)
    kh_i, kw_i, j_i, wo_i = np.meshgrid(
        np.arange(3), np.arange(3), np.arange(hf), np.arange(W), indexing="ij")
    kh_i, kw_i, j_i, wo_i = (a.reshape(-1) for a in (kh_i, kw_i, j_i, wo_i))
    vals = jnp.transpose(wt[:, kh_i, kw_i], (1, 0, 2, 3))  # (L, 3, Cin, Cout)
    t6 = jnp.zeros((hf + 2, W + 2, hf, W, 3, Cin, Cout), w_oidhw.dtype)
    t6 = t6.at[j_i + kh_i, wo_i + kw_i, j_i, wo_i].set(vals)
    t6 = jnp.transpose(t6, (4, 0, 1, 5, 2, 3, 6))          # (kd,g,wp,Cin,j,wo,Cout)
    return t6.reshape(3, (hf + 2) * (W + 2) * Cin, hf * W * Cout)


# ----------------------------------------------------------------------------
# Config selection (generation-aware VMEM budget, lane-dense output width)
# ----------------------------------------------------------------------------
def _vmem_capacity_bytes():
    try:
        return int(pltpu.get_tpu_info().vmem_capacity_bytes)
    except Exception:
        return 64 * 1024 * 1024  # conservative: v7x per-TensorCore VMEM


def _pick_hf(H, W, Cout):
    """Smallest divisor hf of H such that hf*W*Cout is lane-dense (mult of 128),
    else the smallest with >= 128 lanes, else H."""
    lane = W * Cout
    divisors = [d for d in range(1, H + 1) if H % d == 0]
    for d in divisors:
        if (d * lane) % _LANE == 0:
            return d
    for d in divisors:
        if d * lane >= _LANE:
            return d
    return H


def _pick_tile_d(N, D, hblk, kb, nb, in_itemsize, budget_bytes):
    divisors = [d for d in range(1, D + 1) if D % d == 0]
    feasible = []
    for td in divisors:
        rows = td * hblk
        vmem = (2 * (td + 2) * hblk * kb * in_itemsize   # input tile   (dbl buf)
                + 2 * 3 * kb * nb * in_itemsize          # banded weight(dbl buf)
                + 2 * rows * nb * 4                      # conv out tile(dbl buf)
                + 2 * 2 * nb * 4                         # stats tile
                + rows * nb * 4)                         # f32 accumulator (spill)
        if vmem <= budget_bytes:
            feasible.append(td)
    if not feasible:
        feasible = [1]
    # Keep both TensorCores fed on megacore parts (v7x): prefer >= 2 grid steps.
    multi = [td for td in feasible if N * (D // td) >= 2]
    return max(multi) if multi else max(feasible)


# ----------------------------------------------------------------------------
# Forward pass
# ----------------------------------------------------------------------------
@functools.partial(jax.jit, static_argnames=("compute_dtype", "tile_d"))
def conv_ins_block(x_ncdhw, w_oidhw, bias=None, *,
                   compute_dtype=jnp.bfloat16, tile_d=None):
    """Forward pass of ConvInsBlock.

    x_ncdhw : (N, Cin, D, H, W)     float32
    w_oidhw : (Cout, Cin, 3, 3, 3)  float32 (PyTorch Conv3d weight layout)
    bias    : (Cout,) or None.  Exactly cancelled by InstanceNorm3d(affine=False),
              so it is ignored (any change to the norm silently needs it back).
    returns : (N, Cout, D, H, W)    float32
    """
    del bias  # mathematical no-op under InstanceNorm(affine=False)

    N, Cin, D, H, W = x_ncdhw.shape
    Cout = w_oidhw.shape[0]

    hf = _pick_hf(H, W, Cout)          # H rows folded into the lane axis
    hblk = H // hf
    Kb = (hf + 2) * (W + 2) * Cin      # contraction width per kd tap
    Nb = hf * W * Cout                 # lane-dense output width
    itemsize = jnp.dtype(compute_dtype).itemsize

    vmem_cap = _vmem_capacity_bytes()
    vmem_limit = int(0.875 * vmem_cap)
    if tile_d is None:
        tile_d = _pick_tile_d(N, D, hblk, Kb, Nb, itemsize,
                              budget_bytes=int(0.75 * vmem_cap))
    if D % tile_d != 0:
        raise ValueError(f"tile_d={tile_d} must divide D={D}")
    n_tiles = D // tile_d
    rows = tile_d * hblk

    # ---- trace-time layout plumbing: NCDHW -> banded, per-D-tile layout -----
    x = jnp.transpose(x_ncdhw, (0, 2, 3, 4, 1))                  # NDHWC
    x = jnp.pad(x, ((0, 0), (1, 1), (1, 1), (1, 1), (0, 0)))     # (N,D+2,H+2,W+2,Cin)
    # Unfold the (hf+2)-wide h windows onto the lane axis.
    slabs = [x[:, :, g:g + (hblk - 1) * hf + 1:hf, :, :] for g in range(hf + 2)]
    xb = jnp.stack(slabs, axis=3)                 # (N, D+2, hblk, hf+2, W+2, Cin)
    # Group padded-D rows per tile (each tile carries its own 2-row D halo).
    tiles = [xb[:, i * tile_d:i * tile_d + tile_d + 2] for i in range(n_tiles)]
    xt = jnp.stack(tiles, axis=1)
    xt = xt.reshape(N, n_tiles, (tile_d + 2) * hblk, Kb).astype(compute_dtype)

    t = _build_banded_weights(w_oidhw, W, hf).astype(compute_dtype)

    conv_flops = 2 * N * n_tiles * 3 * rows * Kb * Nb
    conv_bytes = (xt.size * itemsize + t.size * itemsize
                  + 4 * (N * n_tiles * rows * Nb + N * n_tiles * 2 * Nb))

    # ------------- Pass 1: conv + per-tile channel statistics ----------------
    conv_out, stats = pl.pallas_call(
        functools.partial(_conv_pass_kernel, tile_d=tile_d, hblk=hblk),
        out_shape=(
            jax.ShapeDtypeStruct((N, n_tiles, rows, Nb), jnp.float32),
            jax.ShapeDtypeStruct((N, n_tiles, 2, Nb), jnp.float32),
        ),
        grid_spec=pltpu.PrefetchScalarGridSpec(
            num_scalar_prefetch=0,
            grid=(N, n_tiles),
            in_specs=[
                pl.BlockSpec((None, None, (tile_d + 2) * hblk, Kb),
                             lambda n, i: (n, i, 0, 0)),
                pl.BlockSpec((3, Kb, Nb), lambda n, i: (0, 0, 0)),
            ],
            out_specs=[
                pl.BlockSpec((None, None, rows, Nb), lambda n, i: (n, i, 0, 0)),
                pl.BlockSpec((None, None, 2, Nb), lambda n, i: (n, i, 0, 0)),
            ],
        ),
        compiler_params=pltpu.CompilerParams(
            dimension_semantics=("parallel", "parallel"),
            vmem_limit_bytes=vmem_limit),
        cost_estimate=pl.CostEstimate(
            flops=conv_flops, transcendentals=0, bytes_accessed=conv_bytes),
    )(xt, t)

    # ------------- Finish InstanceNorm statistics (tiny, plain jnp) ----------
    cnt = float(D * H * W)
    s = stats.reshape(N, n_tiles, 2, hf * W, Cout).sum(axis=(1, 3))   # (N,2,Cout)
    mean = s[:, 0, :] / cnt
    # Single-pass E[x^2]-E[x]^2 in f32; guarded against cancellation going
    # negative (good enough at these volumes; see review's correctness note).
    var = jnp.maximum(s[:, 1, :] / cnt - mean * mean, 0.0)
    rstd = jax.lax.rsqrt(var + EPS)
    scale = jnp.tile(rstd[:, None, :], (1, hf * W, 1)).reshape(N, 1, Nb)
    shift = jnp.tile((-mean * rstd)[:, None, :], (1, hf * W, 1)).reshape(N, 1, Nb)

    # --------------- Pass 2: normalize + LeakyReLU, in place -----------------
    out2 = pl.pallas_call(
        _norm_lrelu_kernel,
        out_shape=jax.ShapeDtypeStruct((N, n_tiles, rows, Nb), jnp.float32),
        grid_spec=pltpu.PrefetchScalarGridSpec(
            num_scalar_prefetch=0,
            grid=(N, n_tiles),
            in_specs=[
                pl.BlockSpec((None, None, rows, Nb), lambda n, i: (n, i, 0, 0)),
                pl.BlockSpec((None, 1, Nb), lambda n, i: (n, 0, 0)),
                pl.BlockSpec((None, 1, Nb), lambda n, i: (n, 0, 0)),
            ],
            out_specs=pl.BlockSpec((None, None, rows, Nb),
                                   lambda n, i: (n, i, 0, 0)),
        ),
        compiler_params=pltpu.CompilerParams(
            dimension_semantics=("parallel", "parallel"),
            vmem_limit_bytes=vmem_limit),
        input_output_aliases={0: 0},
        cost_estimate=pl.CostEstimate(
            flops=3 * N * D * hblk * Nb, transcendentals=0,
            bytes_accessed=4 * (2 * N * D * hblk * Nb + 2 * N * Nb)),
    )(conv_out, scale, shift)

    # (N, n_tiles, tile_d*hblk, hf*W*Cout) -> (N, Cout, D, H, W)
    out = out2.reshape(N, D, hblk, hf, W, Cout)
    out = jnp.transpose(out, (0, 5, 1, 2, 3, 4))
    return out.reshape(N, Cout, D, H, W)


# ----------------------------------------------------------------------------
# Pure-JAX reference (mirrors the PyTorch module, including the conv bias)
# ----------------------------------------------------------------------------
def _reference(x, w, b):
    out = jax.lax.conv_general_dilated(
        x, w, window_strides=(1, 1, 1),
        padding=((1, 1), (1, 1), (1, 1)),
        dimension_numbers=("NCDHW", "OIDHW", "NCDHW"),
        precision=jax.lax.Precision.HIGHEST)
    out = out + b[None, :, None, None, None]
    mean = out.mean(axis=(2, 3, 4), keepdims=True)
    var = ((out - mean) ** 2).mean(axis=(2, 3, 4), keepdims=True)
    out = (out - mean) / jnp.sqrt(var + EPS)
    return jnp.where(out >= 0, out, ALPHA * out)


if __name__ == "__main__":
    def run_case(idx, *, N, Cin, Cout, D, H, W, compute_dtype, tile_d, tol):
        k = jax.random.fold_in(jax.random.PRNGKey(0), idx)
        kx, kw_, kb_ = jax.random.split(k, 3)
        x = jax.random.normal(kx, (N, Cin, D, H, W), dtype=jnp.float32)
        w = jax.random.normal(kw_, (Cout, Cin, 3, 3, 3),
                              dtype=jnp.float32) / np.sqrt(Cin * 27)
        b = 0.1 * jax.random.normal(kb_, (Cout,), dtype=jnp.float32)
        out = jax.block_until_ready(
            conv_ins_block(x, w, b, compute_dtype=compute_dtype, tile_d=tile_d))
        ref = jax.block_until_ready(_reference(x, w, b))
        assert out.shape == (N, Cout, D, H, W)
        np.testing.assert_allclose(np.asarray(out), np.asarray(ref),
                                   atol=tol, rtol=tol)

    # Case 1: W*Cout = 64 < 128 -> two H rows folded into the lane axis (HF=2),
    #         f32 operands, explicit D-tiling (2 tiles), tight tolerance.
    run_case(1, N=2, Cin=4, Cout=8, D=8, H=8, W=8,
             compute_dtype=jnp.float32, tile_d=4, tol=2e-3)

    # Case 2: W*Cout = 128 -> HF=1 path, bf16 operands (f32 accumulation),
    #         automatic (VMEM-budget-driven) D-tile, looser tolerance.
    run_case(2, N=2, Cin=4, Cout=16, D=8, H=8, W=8,
             compute_dtype=jnp.bfloat16, tile_d=None, tol=2e-2)

    print("KERNEL_OK")
</pallas_src>

<mosaic_0001>
module attributes {stable_mosaic.version = 11 : i64} {
  func.func @_conv_pass_kernel(%arg0: i32, %arg1: i32, %arg2: memref<1x1x24x160xf32, #tpu.memory_space<vmem>>, %arg3: memref<3x160x128xf32, #tpu.memory_space<vmem>>, %arg4: memref<1x1x16x128xf32, #tpu.memory_space<vmem>>, %arg5: memref<1x1x2x128xf32, #tpu.memory_space<vmem>>) attributes {dimension_semantics = [#tpu.dimension_semantics<parallel>, #tpu.dimension_semantics<parallel>], iteration_bounds = array<i64: 2, 2>, scalar_prefetch = 0 : i64, scratch_operands = 0 : i64, tpu.core_type = #tpu.core_type<tc>, window_params = [{transform_indices = @transform_0, window_bounds = array<i64: 1, 1, 24, 160>}, {pipeline_mode = #tpu.pipeline_mode<synchronous>, transform_indices = @transform_1, window_bounds = array<i64: 3, 160, 128>}, {transform_indices = @transform_2, window_bounds = array<i64: 1, 1, 16, 128>}, {transform_indices = @transform_3, window_bounds = array<i64: 1, 1, 2, 128>}]} {
    %c0 = arith.constant 0 : index
    %c0_0 = arith.constant 0 : index
    %c0_1 = arith.constant 0 : index
    %c0_2 = arith.constant 0 : index
    %0 = vector.load %arg2[%c0, %c0_0, %c0_1, %c0_2] : memref<1x1x24x160xf32, #tpu.memory_space<vmem>>, vector<1x1x16x160xf32>
    %1 = vector.shape_cast %0 : vector<1x1x16x160xf32> to vector<16x160xf32>
    %c0_3 = arith.constant 0 : index
    %c0_4 = arith.constant 0 : index
    %c0_5 = arith.constant 0 : index
    %2 = vector.load %arg3[%c0_3, %c0_4, %c0_5] : memref<3x160x128xf32, #tpu.memory_space<vmem>>, vector<1x160x128xf32>
    %3 = vector.shape_cast %2 : vector<1x160x128xf32> to vector<160x128xf32>
    %cst = arith.constant dense<0.000000e+00> : vector<16x128xf32>
    %4 = tpu.matmul %1, %3, %cst {dimension_numbers = #tpu.dot_dimension_numbers<[1], [0], [0], [1], [0, 0, 1, 1], [], []>} : vector<16x160xf32>, vector<160x128xf32>, vector<16x128xf32> -> vector<16x128xf32>
    %c0_6 = arith.constant 0 : index
    %c0_7 = arith.constant 0 : index
    %c4 = arith.constant 4 : index
    %c0_8 = arith.constant 0 : index
    %5 = vector.load %arg2[%c0_6, %c0_7, %c4, %c0_8] : memref<1x1x24x160xf32, #tpu.memory_space<vmem>>, vector<1x1x16x160xf32>
    %6 = vector.shape_cast %5 : vector<1x1x16x160xf32> to vector<16x160xf32>
    %c1 = arith.constant 1 : index
    %c0_9 = arith.constant 0 : index
    %c0_10 = arith.constant 0 : index
    %7 = vector.load %arg3[%c1, %c0_9, %c0_10] : memref<3x160x128xf32, #tpu.memory_space<vmem>>, vector<1x160x128xf32>
    %8 = vector.shape_cast %7 : vector<1x160x128xf32> to vector<160x128xf32>
    %cst_11 = arith.constant dense<0.000000e+00> : vector<16x128xf32>
    %9 = tpu.matmul %6, %8, %cst_11 {dimension_numbers = #tpu.dot_dimension_numbers<[1], [0], [0], [1], [0, 0, 1, 1], [], []>} : vector<16x160xf32>, vector<160x128xf32>, vector<16x128xf32> -> vector<16x128xf32>
    %10 = arith.addf %4, %9 : vector<16x128xf32>
    %c0_12 = arith.constant 0 : index
    %c0_13 = arith.constant 0 : index
    %c8 = arith.constant 8 : index
    %c0_14 = arith.constant 0 : index
    %11 = vector.load %arg2[%c0_12, %c0_13, %c8, %c0_14] : memref<1x1x24x160xf32, #tpu.memory_space<vmem>>, vector<1x1x16x160xf32>
    %12 = vector.shape_cast %11 : vector<1x1x16x160xf32> to vector<16x160xf32>
    %c2 = arith.constant 2 : index
    %c0_15 = arith.constant 0 : index
    %c0_16 = arith.constant 0 : index
    %13 = vector.load %arg3[%c2, %c0_15, %c0_16] : memref<3x160x128xf32, #tpu.memory_space<vmem>>, vector<1x160x128xf32>
    %14 = vector.shape_cast %13 : vector<1x160x128xf32> to vector<160x128xf32>
    %cst_17 = arith.constant dense<0.000000e+00> : vector<16x128xf32>
    %15 = tpu.matmul %12, %14, %cst_17 {dimension_numbers = #tpu.dot_dimension_numbers<[1], [0], [0], [1], [0, 0, 1, 1], [], []>} : vector<16x160xf32>, vector<160x128xf32>, vector<16x128xf32> -> vector<16x128xf32>
    %16 = arith.addf %10, %15 : vector<16x128xf32>
    %c0_18 = arith.constant 0 : index
    %c0_19 = arith.constant 0 : index
    %c0_20 = arith.constant 0 : index
    %c0_21 = arith.constant 0 : index
    %17 = vector.load %arg4[%c0_18, %c0_19, %c0_20, %c0_21] : memref<1x1x16x128xf32, #tpu.memory_space<vmem>>, vector<1x1x16x128xf32>
    %18 = vector.shape_cast %17 : vector<1x1x16x128xf32> to vector<16x128xf32>
    %19 = vector.shape_cast %16 : vector<16x128xf32> to vector<1x1x16x128xf32>
    tpu.vector_store %arg4[%c0_18, %c0_19, %c0_20, %c0_21], %19 {strides = array<i32>} : memref<1x1x16x128xf32, #tpu.memory_space<vmem>>, vector<1x1x16x128xf32>,
    %cst_22 = arith.constant dense<0.000000e+00> : vector<128xf32>
    %20 = vector.multi_reduction <add>, %16, %cst_22 [0] : vector<16x128xf32> to vector<128xf32>
    %21 = vector.shape_cast %20 : vector<128xf32> to vector<1x128xf32>
    %c0_23 = arith.constant 0 : index
    %c0_24 = arith.constant 0 : index
    %c0_25 = arith.constant 0 : index
    %c0_26 = arith.constant 0 : index
    %22 = vector.load %arg5[%c0_23, %c0_24, %c0_25, %c0_26] : memref<1x1x2x128xf32, #tpu.memory_space<vmem>>, vector<1x1x1x128xf32>
    %23 = vector.shape_cast %22 : vector<1x1x1x128xf32> to vector<1x128xf32>
    %24 = vector.shape_cast %21 : vector<1x128xf32> to vector<1x1x1x128xf32>
    tpu.vector_store %arg5[%c0_23, %c0_24, %c0_25, %c0_26], %24 {strides = array<i32>} : memref<1x1x2x128xf32, #tpu.memory_space<vmem>>, vector<1x1x1x128xf32>,
    %25 = arith.mulf %16, %16 : vector<16x128xf32>
    %cst_27 = arith.constant dense<0.000000e+00> : vector<128xf32>
    %26 = vector.multi_reduction <add>, %25, %cst_27 [0] : vector<16x128xf32> to vector<128xf32>
    %27 = vector.shape_cast %26 : vector<128xf32> to vector<1x128xf32>
    %c0_28 = arith.constant 0 : index
    %c0_29 = arith.constant 0 : index
    %c1_30 = arith.constant 1 : index
    %c0_31 = arith.constant 0 : index
    %28 = vector.load %arg5[%c0_28, %c0_29, %c1_30, %c0_31] : memref<1x1x2x128xf32, #tpu.memory_space<vmem>>, vector<1x1x1x128xf32>
    %29 = vector.shape_cast %28 : vector<1x1x1x128xf32> to vector<1x128xf32>
    %30 = vector.shape_cast %27 : vector<1x128xf32> to vector<1x1x1x128xf32>
    tpu.vector_store %arg5[%c0_28, %c0_29, %c1_30, %c0_31], %30 {strides = array<i32>} : memref<1x1x2x128xf32, #tpu.memory_space<vmem>>, vector<1x1x1x128xf32>,
    return
  }
  func.func @transform_0(%arg0: i32, %arg1: i32) -> (i32, i32, i32, i32) {
    %c0_i32 = arith.constant 0 : i32
    %c0_i32_0 = arith.constant 0 : i32
    %c0_i32_1 = arith.constant 0 : i32
    return %arg0, %arg1, %c0_i32, %c0_i32_0 : i32, i32, i32, i32
  }
  func.func @transform_1(%arg0: i32, %arg1: i32) -> (i32, i32, i32) {
    %c0_i32 = arith.constant 0 : i32
    %c0_i32_0 = arith.constant 0 : i32
    %c0_i32_1 = arith.constant 0 : i32
    %c0_i32_2 = arith.constant 0 : i32
    return %c0_i32, %c0_i32_0, %c0_i32_1 : i32, i32, i32
  }
  func.func @transform_2(%arg0: i32, %arg1: i32) -> (i32, i32, i32, i32) {
    %c0_i32 = arith.constant 0 : i32
    %c0_i32_0 = arith.constant 0 : i32
    %c0_i32_1 = arith.constant 0 : i32
    return %arg0, %arg1, %c0_i32, %c0_i32_0 : i32, i32, i32, i32
  }
  func.func @transform_3(%arg0: i32, %arg1: i32) -> (i32, i32, i32, i32) {
    %c0_i32 = arith.constant 0 : i32
    %c0_i32_0 = arith.constant 0 : i32
    %c0_i32_1 = arith.constant 0 : i32
    return %arg0, %arg1, %c0_i32, %c0_i32_0 : i32, i32, i32, i32
  }
}

module attributes {stable_mosaic.version = 11 : i64} {
  func.func @_norm_lrelu_kernel(%arg0: i32, %arg1: i32, %arg2: memref<1x1x16x128xf32, #tpu.memory_space<vmem>>, %arg3: memref<1x1x128xf32, #tpu.memory_space<vmem>>, %arg4: memref<1x1x128xf32, #tpu.memory_space<vmem>>, %arg5: memref<1x1x16x128xf32, #tpu.memory_space<vmem>>) attributes {dimension_semantics = [#tpu.dimension_semantics<parallel>, #tpu.dimension_semantics<parallel>], iteration_bounds = array<i64: 2, 2>, scalar_prefetch = 0 : i64, scratch_operands = 0 : i64, tpu.core_type = #tpu.core_type<tc>, window_params = [{transform_indices = @transform_0, window_bounds = array<i64: 1, 1, 16, 128>}, {transform_indices = @transform_1, window_bounds = array<i64: 1, 1, 128>}, {transform_indices = @transform_2, window_bounds = array<i64: 1, 1, 128>}, {transform_indices = @transform_3, window_bounds = array<i64: 1, 1, 16, 128>}]} {
    %c0 = arith.constant 0 : index
    %c0_0 = arith.constant 0 : index
    %c0_1 = arith.constant 0 : index
    %c0_2 = arith.constant 0 : index
    %0 = vector.load %arg2[%c0, %c0_0, %c0_1, %c0_2] : memref<1x1x16x128xf32, #tpu.memory_space<vmem>>, vector<1x1x16x128xf32>
    %1 = vector.shape_cast %0 : vector<1x1x16x128xf32> to vector<16x128xf32>
    %c0_3 = arith.constant 0 : index
    %c0_4 = arith.constant 0 : index
    %c0_5 = arith.constant 0 : index
    %2 = vector.load %arg3[%c0_3, %c0_4, %c0_5] : memref<1x1x128xf32, #tpu.memory_space<vmem>>, vector<1x1x128xf32>
    %3 = vector.shape_cast %2 : vector<1x1x128xf32> to vector<1x128xf32>
    %4 = vector.broadcast %3 : vector<1x128xf32> to vector<16x128xf32>
    %5 = arith.mulf %1, %4 : vector<16x128xf32>
    %c0_6 = arith.constant 0 : index
    %c0_7 = arith.constant 0 : index
    %c0_8 = arith.constant 0 : index
    %6 = vector.load %arg4[%c0_6, %c0_7, %c0_8] : memref<1x1x128xf32, #tpu.memory_space<vmem>>, vector<1x1x128xf32>
    %7 = vector.shape_cast %6 : vector<1x1x128xf32> to vector<1x128xf32>
    %8 = vector.broadcast %7 : vector<1x128xf32> to vector<16x128xf32>
    %9 = arith.addf %5, %8 : vector<16x128xf32>
    %cst = arith.constant 0.000000e+00 : f32
    %10 = vector.broadcast %cst : f32 to vector<16x128xf32>
    %11 = arith.cmpf oge, %9, %10 : vector<16x128xf32>
    %cst_9 = arith.constant 1.000000e-01 : f32
    %12 = vector.broadcast %cst_9 : f32 to vector<16x128xf32>
    %13 = arith.mulf %12, %9 : vector<16x128xf32>
    %14 = arith.select %11, %9, %13 : vector<16x128xi1>, vector<16x128xf32>
    %c0_10 = arith.constant 0 : index
    %c0_11 = arith.constant 0 : index
    %c0_12 = arith.constant 0 : index
    %c0_13 = arith.constant 0 : index
    %15 = vector.load %arg5[%c0_10, %c0_11, %c0_12, %c0_13] : memref<1x1x16x128xf32, #tpu.memory_space<vmem>>, vector<1x1x16x128xf32>
    %16 = vector.shape_cast %15 : vector<1x1x16x128xf32> to vector<16x128xf32>
    %17 = vector.shape_cast %14 : vector<16x128xf32> to vector<1x1x16x128xf32>
    tpu.vector_store %arg5[%c0_10, %c0_11, %c0_12, %c0_13], %17 {strides = array<i32>} : memref<1x1x16x128xf32, #tpu.memory_space<vmem>>, vector<1x1x16x128xf32>,
    return
  }
  func.func @transform_0(%arg0: i32, %arg1: i32) -> (i32, i32, i32, i32) {
    %c0_i32 = arith.constant 0 : i32
    %c0_i32_0 = arith.constant 0 : i32
    %c0_i32_1 = arith.constant 0 : i32
    return %arg0, %arg1, %c0_i32, %c0_i32_0 : i32, i32, i32, i32
  }
  func.func @transform_1(%arg0: i32, %arg1: i32) -> (i32, i32, i32) {
    %c0_i32 = arith.constant 0 : i32
    %c0_i32_0 = arith.constant 0 : i32
    %c0_i32_1 = arith.constant 0 : i32
    return %arg0, %c0_i32, %c0_i32_0 : i32, i32, i32
  }
  func.func @transform_2(%arg0: i32, %arg1: i32) -> (i32, i32, i32) {
    %c0_i32 = arith.constant 0 : i32
    %c0_i32_0 = arith.constant 0 : i32
    %c0_i32_1 = arith.constant 0 : i32
    return %arg0, %c0_i32, %c0_i32_0 : i32, i32, i32
  }
  func.func @transform_3(%arg0: i32, %arg1: i32) -> (i32, i32, i32, i32) {
    %c0_i32 = arith.constant 0 : i32
    %c0_i32_0 = arith.constant 0 : i32
    %c0_i32_1 = arith.constant 0 : i32
    return %arg0, %arg1, %c0_i32, %c0_i32_0 : i32, i32, i32, i32
  }
}

</mosaic_0001>

<bundles_post_ra>
// kernel: conv_ins_block.2
= control target key start
LH: loop header
LB: loop body
LE: loop exit
PB: predicated region body
PF: predicated region fallthrough
CT: control target
= control target key end

     0   :  { %s999_s12 = smov 0   ;;  %s1001_s13 = smov 0   ;;  %s1329_s0 = inlined_call_operand.vmem [shape: f32[2,2,24,160], index: 0, kind: input, shape index: {}]   ;;  %s1330_s1 = inlined_call_operand.vmem [shape: f32[3,160,128], index: 1, kind: input, shape index: {}]   ;;  %s1331_s2 = inlined_call_operand.vmem [shape: f32[2,2,16,128], index: 2, kind: output, shape index: {0}]   ;;  %s1332_s3 = inlined_call_operand.vmem [shape: f32[2,2,2,128], index: 3, kind: output, shape index: {1}]  }
   0x1   :  { %s1003_s14 = smov 0   ;;  %s1005_s15 = smov 0  }
   0x2   :  { %s1007_s16 = smov 0  }
   0x3 LB: > { %s23_s17 = sadd.s32 1, %s968_s14  ;;  %s26_s18 = sadd.s32 1, %s972_s15  ;;  %s976_s16 = sphi %s1007_s16, %s14_s16   ;;  %s972_s15 = sphi %s1005_s15, %s1336_s15   ;;  %s968_s14 = sphi %s1003_s14, %s1335_s14   ;;  %s964_s13 = sphi %s1001_s13, %s1334_s13   ;;  %s960_s12 = sphi %s999_s12, %s1333_s12  }
   0x4   : > { %p24_p0 = scmp.ge.s32.totalorder %s23_s17, 2  ;;  %p725_p1 = scmp.ge.s32.totalorder %s976_s16, 1 }
   0x5   : > { %p162_p2 = scmp.lt.s32.totalorder %s976_s16, 5 }
   0x6   : > { %s1338_s17 = smov (%p24_p0, %s23_s17), 0  ;;  %s1340_s18 = smov (!%p24_p0, %s26_s18), %s972_s15 }
   0x7   : > { %p163_p3 = pnand %p725_p1, %p162_p2  ;;  %p28_p4 = scmp.ge.s32.totalorder %s1340_s18, 2 }
   0x8   : > { %v732_v0 = vld [vmem:[%s1330_s1 + $0xa0] sm:$0xff] (!%p163_p3)  ;;  %v733_v1 = vld [vmem:[%s1330_s1 + $0xa8] sm:$0xff] (!%p163_p3)  ;;  %p202_p5 = scmp.lt.s32.totalorder (!%p163_p3), %s964_s13, 1  ;;  %p204_p6 = scmp.lt.s32.totalorder (!%p163_p3), %s960_s12, 1  ;;  %v978_v3 = vmov (!%p163_p3), 0.0|0.0   ;;  %v734_v6 = vld [vmem:[%s1330_s1 + $0xb0] sm:$0xff] (!%p163_p3) }
   0x9   : > { %s1342_s18 = smov (%p28_p4, %s1340_s18), 0  ;;  %166 = sbr.rel (%p163_p3) target bundleno = 323 (0x143), region = 28 }
   0xa   : > { %v232_v2 = vld [vmem:[%s1330_s1] sm:$0xff] (!%p163_p3)  ;;  %780 = vmatprep.subr.bf16.mxu1 (!%p163_p3), %v978_v3  ;;  %810 = vmatprep.subr.bf16.mxu0 (!%p163_p3), %v978_v3  ;;  %v781_v4 = vpack.c.bf16 (!%p163_p3), %v733_v1, %v732_v0  ;;  %v233_v5 = vld [vmem:[%s1330_s1 + $0x8] sm:$0xff] (!%p163_p3)  ;;  %v735_v7 = vld [vmem:[%s1330_s1 + $0xb8] sm:$0xff] (!%p163_p3)  ;;  %vm296_vm0 = vcmask (!%p163_p3), 261120   ;;  %vm283_vm1 = vcmask (!%p163_p3), 1043456  }
   0xb   : > { %v811_v8 = vpack.c.bf16 (!%p163_p3), %v233_v5, %v232_v2  ;;  %v234_v9 = vld [vmem:[%s1330_s1 + $0x10] sm:$0xff] (!%p163_p3)  ;;  %v235_v10 = vld [vmem:[%s1330_s1 + $0x18] sm:$0xff] (!%p163_p3)  ;;  %v784_v11 = vpack.c.bf16 (!%p163_p3), %v735_v7, %v734_v6  ;;  %v736_v13 = vld [vmem:[%s1330_s1 + $0xc0] sm:$0xff] (!%p163_p3) }
   0xc   : > { %782 = vmatpush1.bf16.msra.mxu1 (!%p163_p3), %v781_v4  ;;  %v814_v12 = vpack.c.bf16 (!%p163_p3), %v235_v10, %v234_v9  ;;  %v737_v14 = vld [vmem:[%s1330_s1 + $0xc8] sm:$0xff] (!%p163_p3)  ;;  %v236_v15 = vld [vmem:[%s1330_s1 + $0x20] sm:$0xff] (!%p163_p3)  ;;  %v738_v19 = vld [vmem:[%s1330_s1 + $0xd0] sm:$0xff] (!%p163_p3) }
   0xd   : > { %812 = vmatpush1.bf16.msra.mxu0 (!%p163_p3), %v811_v8  ;;  %783 = vmatprep.subr.bf16.mxu1 (!%p163_p3), %v978_v3  ;;  %v237_v16 = vld [vmem:[%s1330_s1 + $0x28] sm:$0xff] (!%p163_p3)  ;;  %v787_v17 = vpack.c.bf16 (!%p163_p3), %v737_v14, %v736_v13  ;;  %v739_v20 = vld [vmem:[%s1330_s1 + $0xd8] sm:$0xff] (!%p163_p3)  ;;  %v238_v21 = vld [vmem:[%s1330_s1 + $0x30] sm:$0xff] (!%p163_p3) }
   0xe   : > { %813 = vmatprep.subr.bf16.mxu0 (!%p163_p3), %v978_v3  ;;  %v817_v18 = vpack.c.bf16 (!%p163_p3), %v237_v16, %v236_v15  ;;  %v239_v22 = vld [vmem:[%s1330_s1 + $0x38] sm:$0xff] (!%p163_p3)  ;;  %v790_v23 = vpack.c.bf16 (!%p163_p3), %v739_v20, %v738_v19  ;;  %v740_v25 = vld [vmem:[%s1330_s1 + $0xe0] sm:$0xff] (!%p163_p3)  ;;  %v741_v26 = vld [vmem:[%s1330_s1 + $0xe8] sm:$0xff] (!%p163_p3) }
   0xf   : > { %v820_v24 = vpack.c.bf16 (!%p163_p3), %v239_v22, %v238_v21  ;;  %v240_v27 = vld [vmem:[%s1330_s1 + $0x40] sm:$0xff] (!%p163_p3)  ;;  %v241_v28 = vld [vmem:[%s1330_s1 + $0x48] sm:$0xff] (!%p163_p3)  ;;  %v793_v34 = vpack.c.bf16 (!%p163_p3), %v741_v26, %v740_v25  ;;  %v742_v36 = vld [vmem:[%s1330_s1 + $0xf0] sm:$0xff] (!%p163_p3) }
  0x10   : > { %s1344_s13 = smov (!%p202_p5, %s964_s13), 1  ;;  %s1346_s12 = smov (!%p204_p6, %s960_s12), 1  ;;  %785 = vmatpush1.bf16.msra.mxu1 %v784_v11  ;;  %v823_v35 = vpack.c.bf16 %v241_v28, %v240_v27  ;;  %v743_v37 = vld [vmem:[%s1330_s1 + $0xf8] sm:$0xff]  ;;  %v242_v39 = vld [vmem:[%s1330_s1 + $0x50] sm:$0xff]  ;;  %v744_v43 = vld [vmem:[%s1330_s1 + $0x100] sm:$0xff] }
  0x11   : > { %s896_s19 = smul.u32 12, %s1344_s13  ;;  %815 = vmatpush1.bf16.msra.mxu0 %v814_v12  ;;  %786 = vmatprep.subr.bf16.mxu1 %v978_v3  ;;  %v243_v40 = vld [vmem:[%s1330_s1 + $0x58] sm:$0xff]  ;;  %v796_v41 = vpack.c.bf16 %v743_v37, %v742_v36  ;;  %v745_v44 = vld [vmem:[%s1330_s1 + $0x108] sm:$0xff]  ;;  %v244_v45 = vld [vmem:[%s1330_s1 + $0x60] sm:$0xff]  ;;  %s728_s4 = sshll.u32 %s1344_s13, 2 }
  0x12   : > { %s895_s24 = smul.u32 6, %s1346_s12  ;;  %816 = vmatprep.subr.bf16.mxu0 %v978_v3  ;;  %v826_v42 = vpack.c.bf16 %v243_v40, %v242_v39  ;;  %v245_v46 = vld [vmem:[%s1330_s1 + $0x68] sm:$0xff]  ;;  %v799_v47 = vpack.c.bf16 %v745_v44, %v744_v43  ;;  %v746_v49 = vld [vmem:[%s1330_s1 + $0x110] sm:$0xff]  ;;  %v747_v50 = vld [vmem:[%s1330_s1 + $0x118] sm:$0xff]  ;;  %s730_s9 = sshll.u32 %s1344_s13, 1 }
  0x13   : > { %v829_v48 = vpack.c.bf16 %v245_v46, %v244_v45  ;;  %v246_v51 = vld [vmem:[%s1330_s1 + $0x70] sm:$0xff]  ;;  %v247_v52 = vld [vmem:[%s1330_s1 + $0x78] sm:$0xff]  ;;  %v802_v53 = vpack.c.bf16 %v747_v50, %v746_v49  ;;  %v748_v55 = vld [vmem:[%s1330_s1 + $0x120] sm:$0xff]  ;;  %s225_s11 = sadd.s32 %s730_s9, %s1346_s12 }
  0x14   : > { %s208_s25 = sadd.s32 %s896_s19, %s895_s24  ;;  %788 = vmatpush1.bf16.msra.mxu1 %v787_v17  ;;  %v832_v54 = vpack.c.bf16 %v247_v52, %v246_v51  ;;  %v749_v56 = vld [vmem:[%s1330_s1 + $0x128] sm:$0xff]  ;;  %v248_v57 = vld [vmem:[%s1330_s1 + $0x80] sm:$0xff]  ;;  %v750_v60 = vld [vmem:[%s1330_s1 + $0x130] sm:$0xff]  ;;  %s731_s19 = sshll.u32 %s225_s11, 1 }
  0x15   : > { %s726_s30 = sshll.u32 %s208_s25, 3  ;;  %818 = vmatpush1.bf16.msra.mxu0 %v817_v18  ;;  %789 = vmatprep.subr.bf16.mxu1 %v978_v3  ;;  %v249_v58 = vld [vmem:[%s1330_s1 + $0x88] sm:$0xff]  ;;  %v805_v59 = vpack.c.bf16 %v749_v56, %v748_v55  ;;  %v751_v62 = vld [vmem:[%s1330_s1 + $0x138] sm:$0xff]  ;;  %v250_v1 = vld [vmem:[%s1330_s1 + $0x90] sm:$0xff]  ;;  %s227_s22 = scalar_lea.vmem %s1332_s3, %s731_s19 }
  0x16   : > { %s1102_s10 = scalar_lea.vmem %s1329_s0, %s726_s30  ;;  %819 = vmatprep.subr.bf16.mxu0 %v978_v3  ;;  %v835_v61 = vpack.c.bf16 %v249_v58, %v248_v57  ;;  %v251_v2 = vld [vmem:[%s1330_s1 + $0x98] sm:$0xff]  ;;  %v808_v4 = vpack.c.bf16 %v751_v62, %v750_v60  ;;  %v756_v9 = vld [vmem:[%s1330_s1 + $0x140] sm:$0xff]  ;;  %v757_v10 = vld [vmem:[%s1330_s1 + $0x148] sm:$0xff]  ;;  %s727_s30 = sshll.u32 %s1346_s12, 1 }
  0x17   : > { %v1119_v29 = vld [vmem:[%s1102_s10 + $0x18] sm:$0xff]  ;;  %v253_v30 = vld [vmem:[%s1102_s10 + $0x8] sm:$0xf0]  ;;  %v1193_v63 = vld [vmem:[%s1102_s10 + $0x10] sm:$0xff]  ;;  %v838_v8 = vpack.c.bf16 %v251_v2, %v250_v1  ;;  %v841_v14 = vpack.c.bf16 %v757_v10, %v756_v9  ;;  %s217_s5 = sadd.s32 %s728_s4, %s727_s30 }
  0x18   : > { %v287_v31 = vrot.slane %v253_v30, 4  ;;  %v288_v32 = vrot.slane %v1119_v29, 4  ;;  %v229_v33 = vld [vmem:[%s1102_s10 + $0x8] sm:$0xff]  ;;  %791 = vmatpush1.bf16.msra.mxu1 %v790_v23  ;;  %v252_v0 = vld [vmem:[%s1102_s10] sm:$0xf0]  ;;  %v285_v6 = vrot.slane %v1193_v63, 4 }
  0x19   : > { %754 = vmatprep.mubr.msk.f32.mxu0 %vm296_vm0, %v229_v33  ;;  %821 = vmatpush1.bf16.msra.mxu0 %v820_v24  ;;  %v284_v5 = vrot.slane %v252_v0, 4  ;;  %v255_v7 = vld [vmem:[%s1102_s10 + $0x28] sm:$0xf]  ;;  %v254_v11 = vld [vmem:[%s1102_s10 + $0x20] sm:$0xf]  ;;  %v758_v17 = vld [vmem:[%s1330_s1 + $0x150] sm:$0xff] }
  0x1a   : > { %792 = vmatprep.subr.bf16.mxu1 %v978_v3  ;;  %v289_v38 = vsel %vm283_vm1, %v287_v31, %v288_v32  ;;  %822 = vmatprep.subr.bf16.mxu0 %v978_v3  ;;  %v292_v12 = vrot.slane %v255_v7, 4  ;;  %v290_v15 = vrot.slane %v254_v11, 4  ;;  %v228_v16 = vld [vmem:[%s1102_s10] sm:$0xff]  ;;  %v759_v18 = vld [vmem:[%s1330_s1 + $0x158] sm:$0xff]  ;;  %v761_v23 = vld [vmem:[%s1330_s1 + $0x168] sm:$0xff]  ;;  %s729_s6 = sshll.u32 %s217_s5, 3 }
  0x1b   : > { %752 = vmatprep.mubr.msk.f32.mxu1 %vm296_vm0, %v289_v38  ;;  %v286_v13 = vsel %vm283_vm1, %v284_v5, %v285_v6  ;;  %v844_v20 = vpack.c.bf16 %v759_v18, %v758_v17  ;;  %v760_v22 = vld [vmem:[%s1330_s1 + $0x160] sm:$0xff]  ;;  %v457_v25 = vld [vmem:[%s1102_s10 + $0x28] sm:$0xff]  ;;  %v762_v26 = vld [vmem:[%s1330_s1 + $0x170] sm:$0xff] }
  0x1c   : > { %794 = vmatpush1.bf16.msra.mxu1 %v793_v34  ;;  %v293_v19 = vsel %vm283_vm1, %v288_v32, %v292_v12  ;;  %v291_v21 = vsel %vm283_vm1, %v285_v6, %v290_v15  ;;  %v847_v24 = vpack.c.bf16 %v761_v23, %v760_v22  ;;  %v763_v27 = vld [vmem:[%s1330_s1 + $0x178] sm:$0xff]  ;;  %v764_v30 = vld [vmem:[%s1330_s1 + $0x180] sm:$0xff]  ;;  %v765_v31 = vld [vmem:[%s1330_s1 + $0x188] sm:$0xff] }
  0x1d   : > { %824 = vmatpush1.bf16.msra.mxu0 %v823_v35  ;;  %795 = vmatprep.subr.bf16.mxu1 %v978_v3  ;;  %v850_v28 = vpack.c.bf16 %v763_v27, %v762_v26  ;;  %v853_v32 = vpack.c.bf16 %v765_v31, %v764_v30  ;;  %v767_v33 = vld [vmem:[%s1330_s1 + $0x198] sm:$0xff]  ;;  %v768_v35 = vld [vmem:[%s1330_s1 + $0x1a0] sm:$0xff]  ;;  %v769_v36 = vld [vmem:[%s1330_s1 + $0x1a8] sm:$0xff] }
  0x1e   : > { %825 = vmatprep.subr.bf16.mxu0 %v978_v3  ;;  %v859_v37 = vpack.c.bf16 %v769_v36, %v768_v35  ;;  %v770_v38 = vld [vmem:[%s1330_s1 + $0x1b0] sm:$0xff]  ;;  %v771_v39 = vld [vmem:[%s1330_s1 + $0x1b8] sm:$0xff] }
  0x1f   : > { %v862_v40 = vpack.c.bf16 %v771_v39, %v770_v38  ;;  %v774_v44 = vld [vmem:[%s1330_s1 + $0x1d0] sm:$0xff]  ;;  %v775_v45 = vld [vmem:[%s1330_s1 + $0x1d8] sm:$0xff] }
  0x20   : > { %797 = vmatpush1.bf16.msra.mxu1 %v796_v41  ;;  %v772_v41 = vld [vmem:[%s1330_s1 + $0x1c0] sm:$0xff]  ;;  %v868_v46 = vpack.c.bf16 %v775_v45, %v774_v44 }
  0x21   : > { %827 = vmatpush1.bf16.msra.mxu0 %v826_v42  ;;  %798 = vmatprep.subr.bf16.mxu1 %v978_v3  ;;  %v773_v42 = vld [vmem:[%s1330_s1 + $0x1c8] sm:$0xff] }
  0x22   : > { %828 = vmatprep.subr.bf16.mxu0 %v978_v3  ;;  %v865_v43 = vpack.c.bf16 %v773_v42, %v772_v41 }
  0x24   : > { %800 = vmatpush1.bf16.msra.mxu1 %v799_v47  ;;  %v456_v47 = vld [vmem:[%s1102_s10 + $0x20] sm:$0xff]  ;;  %s219_s10 = scalar_lea.vmem %s1331_s2, %s729_s6 }
  0x25   : > { %830 = vmatpush1.bf16.msra.mxu0 %v829_v48  ;;  %801 = vmatprep.subr.bf16.mxu1 %v978_v3 }
  0x26   : > { %831 = vmatprep.subr.bf16.mxu0 %v978_v3 }
  0x28   : > { %803 = vmatpush1.bf16.msra.mxu1 %v802_v53 }
  0x29   : > { %833 = vmatpush1.bf16.msra.mxu0 %v832_v54  ;;  %804 = vmatprep.subr.bf16.mxu1 %v978_v3 }
  0x2a   : > { %834 = vmatprep.subr.bf16.mxu0 %v978_v3 }
  0x2c   : > { %806 = vmatpush1.bf16.msra.mxu1 %v805_v59 }
  0x2d   : > { %836 = vmatpush1.bf16.msra.mxu0 %v835_v61  ;;  %807 = vmatprep.subr.bf16.mxu1 %v978_v3 }
  0x2e   : > { %837 = vmatprep.subr.bf16.mxu0 %v978_v3 }
  0x30   : > { %809 = vmatpush1.bf16.msra.mxu1 %v808_v4 }
  0x31   : > { %839 = vmatpush1.bf16.msra.mxu0 %v838_v8  ;;  %870 = vmatprep.subr.bf16.mxu1 %v978_v3 }
  0x32   : > { %840 = vmatprep.subr.bf16.mxu0 %v978_v3 }
  0x33   : > { %366 = vmatmul.mubr.f32.vlgmr.msra.gmra.mrb[0].mxu1 %v286_v13 }
  0x34   : > { %446 = vmatmul.mubr.f32.vlgmr.msra.gmra.mrb[0].mxu0 %v228_v16  ;;  %880 = vmatpush1.bf16.msra.mxu1 %v841_v14 }
  0x35   : > { %842 = vmatpush1.bf16.msra.mxu0 %v841_v14  ;;  %871 = vmatprep.subr.bf16.mxu1 %v978_v3 }
  0x36   : > { %843 = vmatprep.subr.bf16.mxu0 %v978_v3  ;;  %753 = vmatprep.mubr.msk.f32.mxu1 %vm296_vm0, %v293_v19 }
  0x37   : > { %755 = vmatprep.mubr.msk.f32.mxu0 %vm296_vm0, %v1119_v29  ;;  %371 = vmatmul.mubr.f32.gmra.mrb[2].mxu1 %v291_v21 }
  0x38   : > { %881 = vmatpush1.bf16.msra.mxu1 %v844_v20  ;;  %451 = vmatmul.mubr.f32.gmra.mrb[2].mxu0 %v1193_v63 }
  0x39   : > { %845 = vmatpush1.bf16.msra.mxu0 %v844_v20  ;;  %872 = vmatprep.subr.bf16.mxu1 %v978_v3 }
  0x3a   : > { %846 = vmatprep.subr.bf16.mxu0 %v978_v3  ;;  %776 = vmatprep.mubr.msk.f32.mxu0 %vm296_vm0, %v1119_v29  ;;  %v766_v29 = vld [vmem:[%s1330_s1 + $0x190] sm:$0xff] }
  0x3b   : > { %777 = vmatprep.mubr.msk.f32.mxu1 %vm296_vm0, %v457_v25  ;;  %v856_v34 = vpack.c.bf16 %v767_v33, %v766_v29 }
  0x3c   : > { %882 = vmatpush1.bf16.msra.mxu1 %v847_v24 }
  0x3d   : > { %848 = vmatpush1.bf16.msra.mxu0 %v847_v24  ;;  %873 = vmatprep.subr.bf16.mxu1 %v978_v3 }
  0x3e   : > { %849 = vmatprep.subr.bf16.mxu0 %v978_v3 }
  0x40   : > { %883 = vmatpush1.bf16.msra.mxu1 %v850_v28 }
  0x41   : > { %851 = vmatpush1.bf16.msra.mxu0 %v850_v28  ;;  %874 = vmatprep.subr.bf16.mxu1 %v978_v3 }
  0x42   : > { %852 = vmatprep.subr.bf16.mxu0 %v978_v3 }
  0x44   : > { %884 = vmatpush1.bf16.msra.mxu1 %v853_v32 }
  0x45   : > { %854 = vmatpush1.bf16.msra.mxu0 %v853_v32  ;;  %875 = vmatprep.subr.bf16.mxu1 %v978_v3 }
  0x46   : > { %855 = vmatprep.subr.bf16.mxu0 %v978_v3 }
  0x48   : > { %885 = vmatpush1.bf16.msra.mxu1 %v856_v34 }
  0x49   : > { %857 = vmatpush1.bf16.msra.mxu0 %v856_v34  ;;  %876 = vmatprep.subr.bf16.mxu1 %v978_v3 }
  0x4a   : > { %858 = vmatprep.subr.bf16.mxu0 %v978_v3 }
  0x4c   : > { %886 = vmatpush1.bf16.msra.mxu1 %v859_v37 }
  0x4d   : > { %860 = vmatpush1.bf16.msra.mxu0 %v859_v37  ;;  %877 = vmatprep.subr.bf16.mxu1 %v978_v3 }
  0x4e   : > { %861 = vmatprep.subr.bf16.mxu0 %v978_v3 }
  0x50   : > { %887 = vmatpush1.bf16.msra.mxu1 %v862_v40 }
  0x51   : > { %863 = vmatpush1.bf16.msra.mxu0 %v862_v40  ;;  %878 = vmatprep.subr.bf16.mxu1 %v978_v3 }
  0x52   : > { %864 = vmatprep.subr.bf16.mxu0 %v978_v3 }
  0x54   : > { %888 = vmatpush1.bf16.msra.mxu1 %v865_v43 }
  0x55   : > { %866 = vmatpush1.bf16.msra.mxu0 %v865_v43  ;;  %879 = vmatprep.subr.bf16.mxu1 %v978_v3 }
  0x56   : > { %867 = vmatprep.subr.bf16.mxu0 %v978_v3 }
  0x58   : > { %889 = vmatpush1.bf16.msra.mxu1 %v868_v46 }
  0x59   : > { %869 = vmatpush1.bf16.msra.mxu0 %v868_v46 }
  0x5b   : > { %552 = vmatmul.mubr.f32.vlgmr.msra.gmra.mrb[4].mxu1 %v456_v47 }
  0x5c   : > { %547 = vmatmul.mubr.f32.vlgmr.msra.gmra.mrb[0].mxu0 %v1193_v63 }
 0x106   : > { %v367_v48 = vpop.f32.mrb[0].mxu1 }
 0x107   : > { %v369_v49 = vpop.f32.mrb[1].mxu1 }
 0x10a   : > { %v372_v50 = vpop.f32.mrb[2].mxu1 }
 0x10b   : > { %v452_v51 = vpop.f32.mrb[2].mxu0  ;;  %v374_v52 = vpop.f32.mrb[3].mxu1 }
 0x10c   : > { %v453_v53 = vadd.f32 %v452_v51, %v372_v50  ;;  %v454_v54 = vpop.f32.mrb[3].mxu0 }
 0x12e   : > { %v553_v3 = vpop.f32.mrb[4].mxu1 }
 0x12f   : > { %v548_v55 = vpop.f32.mrb[0].mxu0  ;;  %v558_v56 = vadd.f32 %v553_v3, %v453_v53  ;;  %v555_v57 = vpop.f32.mrb[5].mxu1 }
 0x130   : > { %v890_v58 = vadd.f32 %v548_v55, %v367_v48  ;;  %v550_v59 = vpop.f32.mrb[1].mxu0 }
 0x131   : > { %560 = vst [vmem:[%s219_s10 + $0x8] sm:$0xff] %v558_v56  ;;  %v570_v60 = vmul.f32 %v558_v56, %v558_v56 }
 0x132   : > { %559 = vst [vmem:[%s219_s10] sm:$0xff] %v890_v58  ;;  %v569_v61 = vmul.f32 %v890_v58, %v890_v58  ;;  %v561_v62 = vadd.f32 %v890_v58, %v558_v56 }
 0x134   : > { %v562_v63 = vrot.slane %v561_v62, 4  ;;  %v571_v0 = vadd.f32 %v570_v60, %v569_v61 }
 0x136   : > { %v563_v1 = vadd.f32 %v562_v63, %v561_v62  ;;  %v572_v2 = vrot.slane %v571_v0, 4 }
 0x138   : > { %v564_v4 = vrot.slane %v563_v1, 2  ;;  %v573_v5 = vadd.f32 %v572_v2, %v571_v0 }
 0x13a   : > { %v565_v6 = vadd.f32 %v564_v4, %v563_v1  ;;  %v574_v7 = vrot.slane %v573_v5, 2 }
 0x13c   : > { %v566_v8 = vrot.slane %v565_v6, 1  ;;  %v575_v9 = vadd.f32 %v574_v7, %v573_v5 }
 0x13e   : > { %v567_v10 = vadd.f32 %v566_v8, %v565_v6  ;;  %v576_v11 = vrot.slane %v575_v9, 1 }
 0x140   : > { %568 = vst [vmem:[%s227_s22] sm:$0x1] %v567_v10  ;;  %v577_v12 = vadd.f32 %v576_v11, %v575_v9 }
 0x142   : > { %578 = vst [vmem:[%s227_s22 + $0x1] sm:$0x1] %v577_v12 }
 0x143 PF: > { %s14_s16 = sadd.s32 1, %s976_s16   ;;  %s1333_s12 = smov %s968_s14 }
 0x144   : > { %p11_p7 = scmp.ge.s32.totalorder %s14_s16, 6   ;;  %s1334_s13 = smov %s972_s15 }
 0x145   : > { %s1335_s14 = smov %s1338_s17  ;;  %s1336_s15 = smov %s1342_s18 }
 0x146   :  { %13 = sbr.rel (!%p11_p7) target bundleno = 3 (0x3), region = 72 }

// kernel: mul.12
= control target key start
LH: loop header
LB: loop body
LE: loop exit
PB: predicated region body
PF: predicated region fallthrough
CT: control target
= control target key end

     0   :  { %s34_s0 = inlined_call_operand.vmem [shape: f32[2,8], index: 0, kind: input, shape index: {}]   ;;  %s35_s1 = inlined_call_operand.vmem [shape: f32[2,8], index: 1, kind: input, shape index: {}]   ;;  %s36_s2 = inlined_call_operand.vmem [shape: f32[2,8], index: 2, kind: output, shape index: {}]  }
   0x1   :  { %v3_v0 = vld [vmem:[%s34_s0] sm:$0x3] }
   0x2   :  { %v4_v1 = vld [vmem:[%s35_s1] sm:$0x3] }
   0x3   :  { %v7_v2 = vmul.f32 %v4_v1, %v3_v0 }
   0x5   :  { %9 = vst [vmem:[%s36_s2] sm:$0x3] %v7_v2 }

// kernel: conv_ins_block.3
= control target key start
LH: loop header
LB: loop body
LE: loop exit
PB: predicated region body
PF: predicated region fallthrough
CT: control target
= control target key end

     0   :  { %s491_s12 = smov 0   ;;  %s493_s13 = smov 0   ;;  %s548_s0 = inlined_call_operand.vmem [shape: f32[2,2,16,128], index: 0, kind: input, shape index: {}, may-alias: {0,3}]   ;;  %s549_s1 = inlined_call_operand.vmem [shape: f32[2,1,128], index: 1, kind: input, shape index: {}]   ;;  %s550_s2 = inlined_call_operand.vmem [shape: f32[2,1,128], index: 2, kind: input, shape index: {}]   ;;  %s551_s3 = inlined_call_operand.vmem [shape: f32[2,2,16,128], index: 3, kind: output, shape index: {}, may-alias: {0,3}]  }
   0x1   :  { %s495_s14 = smov 0   ;;  %s497_s15 = smov 0  }
   0x2   :  { %s499_s16 = smov 0  }
   0x3 LB: > { %s22_s17 = sadd.s32 1, %s461_s14  ;;  %s25_s18 = sadd.s32 1, %s465_s15  ;;  %s469_s16 = sphi %s499_s16, %s13_s16   ;;  %s465_s15 = sphi %s497_s15, %s555_s15   ;;  %s461_s14 = sphi %s495_s14, %s554_s14   ;;  %s457_s13 = sphi %s493_s13, %s553_s13   ;;  %s453_s12 = sphi %s491_s12, %s552_s12  }
   0x4   : > { %p23_p0 = scmp.ge.s32.totalorder %s22_s17, 2  ;;  %p380_p1 = scmp.ge.s32.totalorder %s469_s16, 1 }
   0x5   : > { %p173_p2 = scmp.lt.s32.totalorder %s469_s16, 5 }
   0x6   : > { %s557_s17 = smov (%p23_p0, %s22_s17), 0  ;;  %s559_s18 = smov (!%p23_p0, %s25_s18), %s465_s15 }
   0x7   : > { %p174_p3 = pnand %p380_p1, %p173_p2  ;;  %p27_p4 = scmp.ge.s32.totalorder %s559_s18, 2 }
   0x8   : > { %p211_p5 = scmp.lt.s32.totalorder (!%p174_p3), %s457_s13, 1  ;;  %p213_p6 = scmp.lt.s32.totalorder (!%p174_p3), %s453_s12, 1 }
   0x9   : > { %s561_s18 = smov (%p27_p4, %s559_s18), 0  ;;  %177 = sbr.rel (%p174_p3) target bundleno = 31 (0x1f), region = 32 }
  0x10   : > { %s563_s13 = smov (!%p211_p5, %s457_s13), 1  ;;  %s565_s12 = smov (!%p213_p6, %s453_s12), 1 }
  0x11   : > { %s382_s19 = sshll.u32 %s563_s13, 2  ;;  %s222_s22 = scalar_lea.vmem %s549_s1, %s563_s13 }
  0x12   : > { %s381_s23 = sshll.u32 %s565_s12, 1  ;;  %s225_s27 = scalar_lea.vmem %s550_s2, %s563_s13  ;;  %v387_v0 = vld [vmem:[%s222_s22] ss:$0 sm:$0xff] }
  0x13   : > { %s217_s24 = sadd.s32 %s382_s19, %s381_s23  ;;  %v388_v3 = vld [vmem:[%s225_s27] ss:$0 sm:$0xff] }
  0x14   : > { %s383_s28 = sshll.u32 %s217_s24, 3 }
  0x15   : > { %s219_s4 = scalar_lea.vmem %s548_s0, %s383_s28  ;;  %s234_s7 = scalar_lea.vmem %s551_s3, %s383_s28 }
  0x16   : > { %v235_v1 = vld [vmem:[%s219_s4] sm:$0xff]  ;;  %v236_v2 = vld [vmem:[%s219_s4 + $0x8] sm:$0xff] }
  0x17   : > { %v244_v4 = vmul.f32 %v387_v0, %v235_v1  ;;  %v245_v5 = vmul.f32 %v387_v0, %v236_v2 }
  0x19   : > { %v253_v6 = vadd.f32 %v388_v3, %v244_v4  ;;  %v254_v7 = vadd.f32 %v388_v3, %v245_v5 }
  0x1b   : > { %vm255_vm0 = vcmp.ge.f32.partialorder %v253_v6, 0.0  ;;  %v257_v8 = vmul.f32 0.1, %v253_v6  ;;  %vm256_vm1 = vcmp.ge.f32.partialorder %v254_v7, 0.0  ;;  %v258_v9 = vmul.f32 0.1, %v254_v7 }
  0x1d   : > { %v259_v10 = vsel %vm255_vm0, %v253_v6, %v257_v8  ;;  %v260_v11 = vsel %vm256_vm1, %v254_v7, %v258_v9 }
  0x1e   : > { %261 = vst [vmem:[%s234_s7] sm:$0xff] %v259_v10  ;;  %262 = vst [vmem:[%s234_s7 + $0x8] sm:$0xff] %v260_v11 }
  0x1f PF: > { %s13_s16 = sadd.s32 1, %s469_s16   ;;  %s552_s12 = smov %s461_s14 }
  0x20   : > { %p10_p7 = scmp.ge.s32.totalorder %s13_s16, 6   ;;  %s553_s13 = smov %s465_s15 }
  0x21   : > { %s554_s14 = smov %s557_s17  ;;  %s555_s15 = smov %s561_s18 }
  0x22   :  { %12 = sbr.rel (!%p10_p7) target bundleno = 3 (0x3), region = 68 }

</bundles_post_ra>
